<compile_context>
chip_gen: v5e
topology: v5e:2x2
jax: 0.10.0
libtpu: 0.0.40
codegen_flags: <defaults>
</compile_context>

<pallas_src>
import math

import jax
import jax.numpy as jnp
from jax.experimental import pallas as pl
from jax.experimental.pallas import tpu as pltpu

# Model hyper-parameters (small, consistent with the module's __init__).
D_MODEL = 32
NUM_HEADS = 4
D_FF = 64
SEQ = 8
BATCH = 2
EPS = 1e-5  # PyTorch nn.LayerNorm default eps
D_K = D_MODEL // NUM_HEADS


def encoder_layer_kernel(x_ref, wqkv_ref, bqkv_ref, wo_ref, w1_ref, w2_ref,
                         vec_ref, out_ref):
    B, S, D = x_ref.shape
    H, DK = NUM_HEADS, D // NUM_HEADS
    BS = B * S
    NB = B * H            # attention batch (head, batch) pairs
    NQKV = 3 * H * B      # (component, head, batch) triples

    x3 = x_ref[...].astype(jnp.float32)          # (B, S, D)
    x2d = x3.reshape(BS, D)                      # leading-dim merge only (safe)

    # --- tiny bias / LayerNorm vectors (row views of one packed buffer) ---
    b_o = vec_ref[0:1, 0:D]
    g1 = vec_ref[1:2, 0:D]
    be1 = vec_ref[2:3, 0:D]
    b_f1 = vec_ref[3:4, 0:D_FF]
    b_f2 = vec_ref[4:5, 0:D]
    g2 = vec_ref[5:6, 0:D]
    be2 = vec_ref[6:7, 0:D]

    # --- QKV projection: one batched matmul over n = (component, head, batch).
    # Weights were pre-arranged host-side to (3*H*B, D, DK); only a leading-dim
    # broadcast/reshape of x is needed, so Q/K/V come out directly per-head.
    x_nb = jnp.broadcast_to(x3[None], (3 * H, B, S, D)).reshape(NQKV, S, D)
    qkv_h = jnp.einsum('nsd,ndk->nsk', x_nb, wqkv_ref[...],
                       preferred_element_type=jnp.float32) + bqkv_ref[...]
    q_h = qkv_h[0 * NB:1 * NB]                   # (NB, S, DK), n = (head, batch)
    k_h = qkv_h[1 * NB:2 * NB]
    v_h = qkv_h[2 * NB:3 * NB]

    # --- scaled dot-product attention (1/sqrt(d_k) folded into Wq/bq) ---
    s = jnp.einsum('nqd,nkd->nqk', q_h, k_h,
                   preferred_element_type=jnp.float32)          # (NB, S, S)
    m = jnp.max(s, axis=-1, keepdims=True)
    e = jnp.exp(s - m)
    p = e / jnp.sum(e, axis=-1, keepdims=True)   # exact divide (reference parity)
    ctx = jnp.einsum('nqk,nkd->nqd', p, v_h,
                     preferred_element_type=jnp.float32)        # (NB, S, DK)

    # --- combine-heads folded into Wo: sum_h (ctx_h @ Wo_h), no lane concat ---
    ctx_h = ctx.reshape(H, B * S, DK)            # leading-dim regroup only
    attn = jnp.einsum('hmd,hdo->hmo', ctx_h, wo_ref[...],
                      preferred_element_type=jnp.float32)
    attn = jnp.sum(attn, axis=0) + b_o           # (BS, D)

    # TODO(synk): dropout is identity (inference/eval semantics); no RNG applied.

    def layer_norm(h, g, b):
        mu = jnp.mean(h, axis=-1, keepdims=True)
        var = jnp.mean(jnp.square(h - mu), axis=-1, keepdims=True)
        return (h - mu) * jax.lax.rsqrt(var + EPS) * g + b

    # --- residual + LayerNorm 1 ---
    h1 = layer_norm(x2d + attn, g1, be1)

    # --- position-wise feed forward ---
    f = jnp.dot(h1, w1_ref[...], preferred_element_type=jnp.float32) + b_f1
    f = jnp.maximum(f, 0.0)
    f = jnp.dot(f, w2_ref[...], preferred_element_type=jnp.float32) + b_f2

    # --- residual + LayerNorm 2 ---
    out_ref[...] = layer_norm(h1 + f, g2, be2).astype(out_ref.dtype)   # (BS, D)


def pack_params(p):
    """One-time host-side parameter prep (not in the hot path):
       * per-head QKV weight/bias tensors, pre-broadcast over batch, with the
         1/sqrt(d_k) scale folded into Wq/bq,
       * Wo reshaped per-head (head-combine folded into the output projection),
       * all bias / LayerNorm vectors packed into one small buffer."""
    scale = 1.0 / math.sqrt(D_K)

    def per_head_w(w):   # (D, D) -> (H, D, DK)
        return jnp.transpose(w.reshape(D_MODEL, NUM_HEADS, D_K), (1, 0, 2))

    def per_head_b(b):   # (1, D) -> (H, 1, DK)
        return b.reshape(NUM_HEADS, 1, D_K)

    wqkv = jnp.concatenate(
        [per_head_w(p["wq"] * scale), per_head_w(p["wk"]), per_head_w(p["wv"])],
        axis=0)                                               # (3H, D, DK)
    wqkv = jnp.broadcast_to(wqkv[:, None],
                            (3 * NUM_HEADS, BATCH, D_MODEL, D_K))
    wqkv = wqkv.reshape(3 * NUM_HEADS * BATCH, D_MODEL, D_K)  # (3*H*B, D, DK)

    bqkv = jnp.concatenate(
        [per_head_b(p["bq"] * scale), per_head_b(p["bk"]), per_head_b(p["bv"])],
        axis=0)                                               # (3H, 1, DK)
    bqkv = jnp.broadcast_to(bqkv[:, None],
                            (3 * NUM_HEADS, BATCH, 1, D_K))
    bqkv = bqkv.reshape(3 * NUM_HEADS * BATCH, 1, D_K)        # (3*H*B, 1, DK)

    wo_h = p["wo"].reshape(NUM_HEADS, D_K, D_MODEL)           # (H, DK, D)

    vecs = jnp.zeros((8, max(D_MODEL, D_FF)), jnp.float32)
    vecs = vecs.at[0, :D_MODEL].set(p["bo"][0])
    vecs = vecs.at[1, :D_MODEL].set(p["g1"][0])
    vecs = vecs.at[2, :D_MODEL].set(p["be1"][0])
    vecs = vecs.at[3, :D_FF].set(p["bf1"][0])
    vecs = vecs.at[4, :D_MODEL].set(p["bf2"][0])
    vecs = vecs.at[5, :D_MODEL].set(p["g2"][0])
    vecs = vecs.at[6, :D_MODEL].set(p["be2"][0])
    return wqkv, bqkv, wo_h, p["w1"], p["w2"], vecs


def encoder_layer(x, wqkv, bqkv, wo_h, w1, w2, vecs):
    B, S, D = x.shape
    vmem = pl.BlockSpec(memory_space=pltpu.MemorySpace.VMEM)
    out2d = pl.pallas_call(
        encoder_layer_kernel,
        out_shape=jax.ShapeDtypeStruct((B * S, D), x.dtype),
        in_specs=[vmem] * 7,
        out_specs=vmem,
    )(x, wqkv, bqkv, wo_h, w1, w2, vecs)
    return out2d.reshape(B, S, D)   # free wrapper-side reshape


def make_params(key):
    ks = jax.random.split(key, 8)

    def lin(k, fan_in, fan_out):
        bound = 1.0 / jnp.sqrt(fan_in)
        kw, kb = jax.random.split(k)
        w = jax.random.uniform(kw, (fan_in, fan_out), jnp.float32, -bound, bound)
        b = jax.random.uniform(kb, (1, fan_out), jnp.float32, -bound, bound)
        return w, b

    wq, bq = lin(ks[0], D_MODEL, D_MODEL)
    wk, bk = lin(ks[1], D_MODEL, D_MODEL)
    wv, bv = lin(ks[2], D_MODEL, D_MODEL)
    wo, bo = lin(ks[3], D_MODEL, D_MODEL)
    w1, bf1 = lin(ks[4], D_MODEL, D_FF)
    w2, bf2 = lin(ks[5], D_FF, D_MODEL)
    return dict(
        wq=wq, bq=bq, wk=wk, bk=bk, wv=wv, bv=bv, wo=wo, bo=bo,
        w1=w1, bf1=bf1, w2=w2, bf2=bf2,
        g1=jnp.ones((1, D_MODEL), jnp.float32), be1=jnp.zeros((1, D_MODEL), jnp.float32),
        g2=jnp.ones((1, D_MODEL), jnp.float32), be2=jnp.zeros((1, D_MODEL), jnp.float32),
    )


def reference_encoder_layer(x, p):
    def ln(h, g, b):
        mu = jnp.mean(h, axis=-1, keepdims=True)
        var = jnp.mean((h - mu) ** 2, axis=-1, keepdims=True)
        return (h - mu) * jax.lax.rsqrt(var + EPS) * g + b

    q = x @ p["wq"] + p["bq"]
    k = x @ p["wk"] + p["bk"]
    v = x @ p["wv"] + p["bv"]
    B, S, D = x.shape

    def split(t):
        return t.reshape(B, S, NUM_HEADS, D_K).transpose(0, 2, 1, 3)

    qh, kh, vh = split(q), split(k), split(v)
    s = jnp.einsum("bhqd,bhkd->bhqk", qh, kh) / jnp.sqrt(jnp.float32(D_K))
    pr = jax.nn.softmax(s, axis=-1)
    a = jnp.einsum("bhqk,bhkd->bhqd", pr, vh).transpose(0, 2, 1, 3).reshape(B, S, D)
    a = a @ p["wo"] + p["bo"]
    h1 = ln(x + a, p["g1"], p["be1"])
    f = jnp.maximum(h1 @ p["w1"] + p["bf1"], 0.0) @ p["w2"] + p["bf2"]
    return ln(h1 + f, p["g2"], p["be2"])


if __name__ == "__main__":
    key = jax.random.PRNGKey(0)
    kx, kp = jax.random.split(key)
    x = jax.random.normal(kx, (BATCH, SEQ, D_MODEL), jnp.float32)
    params = make_params(kp)
    packed = pack_params(params)   # one-time parameter prep, not in the hot path

    out = jax.block_until_ready(encoder_layer(x, *packed))

    ref = reference_encoder_layer(x, params)
    assert out.shape == (BATCH, SEQ, D_MODEL)
    max_err = float(jnp.max(jnp.abs(out - ref)))
    assert jnp.allclose(out, ref, atol=1e-4, rtol=1e-4), max_err
    print("KERNEL_OK")
</pallas_src>

<mosaic_0001>
module attributes {stable_mosaic.version = 11 : i64} {
  func.func @encoder_layer_kernel(%arg0: memref<2x8x32xf32, #tpu.memory_space<vmem>>, %arg1: memref<24x32x8xf32, #tpu.memory_space<vmem>>, %arg2: memref<24x1x8xf32, #tpu.memory_space<vmem>>, %arg3: memref<4x8x32xf32, #tpu.memory_space<vmem>>, %arg4: memref<32x64xf32, #tpu.memory_space<vmem>>, %arg5: memref<64x32xf32, #tpu.memory_space<vmem>>, %arg6: memref<8x64xf32, #tpu.memory_space<vmem>>, %arg7: memref<16x32xf32, #tpu.memory_space<vmem>>) attributes {dimension_semantics = [], scalar_prefetch = 0 : i64, scratch_operands = 0 : i64, tpu.core_type = #tpu.core_type<tc>} {
    %c0 = arith.constant 0 : index
    %c0_0 = arith.constant 0 : index
    %c0_1 = arith.constant 0 : index
    %0 = vector.load %arg0[%c0, %c0_0, %c0_1] : memref<2x8x32xf32, #tpu.memory_space<vmem>>, vector<2x8x32xf32>
    %1 = vector.shape_cast %0 : vector<2x8x32xf32> to vector<16x32xf32>
    %c0_2 = arith.constant 0 : index
    %c0_3 = arith.constant 0 : index
    %2 = vector.load %arg6[%c0_2, %c0_3] : memref<8x64xf32, #tpu.memory_space<vmem>>, vector<1x32xf32>
    %c1 = arith.constant 1 : index
    %c0_4 = arith.constant 0 : index
    %3 = vector.load %arg6[%c1, %c0_4] : memref<8x64xf32, #tpu.memory_space<vmem>>, vector<1x32xf32>
    %c2 = arith.constant 2 : index
    %c0_5 = arith.constant 0 : index
    %4 = vector.load %arg6[%c2, %c0_5] : memref<8x64xf32, #tpu.memory_space<vmem>>, vector<1x32xf32>
    %c3 = arith.constant 3 : index
    %c0_6 = arith.constant 0 : index
    %5 = vector.load %arg6[%c3, %c0_6] : memref<8x64xf32, #tpu.memory_space<vmem>>, vector<1x64xf32>
    %c4 = arith.constant 4 : index
    %c0_7 = arith.constant 0 : index
    %6 = vector.load %arg6[%c4, %c0_7] : memref<8x64xf32, #tpu.memory_space<vmem>>, vector<1x32xf32>
    %c5 = arith.constant 5 : index
    %c0_8 = arith.constant 0 : index
    %7 = vector.load %arg6[%c5, %c0_8] : memref<8x64xf32, #tpu.memory_space<vmem>>, vector<1x32xf32>
    %c6 = arith.constant 6 : index
    %c0_9 = arith.constant 0 : index
    %8 = vector.load %arg6[%c6, %c0_9] : memref<8x64xf32, #tpu.memory_space<vmem>>, vector<1x32xf32>
    %9 = vector.shape_cast %0 : vector<2x8x32xf32> to vector<1x2x8x32xf32>
    %10 = vector.shape_cast %9 : vector<1x2x8x32xf32> to vector<1x2x8x32xf32>
    %11 = vector.broadcast %10 : vector<1x2x8x32xf32> to vector<12x2x8x32xf32>
    %12 = vector.shape_cast %11 : vector<12x2x8x32xf32> to vector<24x8x32xf32>
    %c0_10 = arith.constant 0 : index
    %c0_11 = arith.constant 0 : index
    %c0_12 = arith.constant 0 : index
    %13 = vector.load %arg1[%c0_10, %c0_11, %c0_12] : memref<24x32x8xf32, #tpu.memory_space<vmem>>, vector<24x32x8xf32>
    "tpu.trace_start"() <{level = 10 : i32, message = "nsd,ndk->nsk"}> : () -> ()
    %cst = arith.constant dense<0.000000e+00> : vector<24x8x8xf32>
    %14 = tpu.matmul %12, %13, %cst {dimension_numbers = #tpu.dot_dimension_numbers<[2], [1], [1], [2], [0, 0, 0, 1, 1, 2], [0], [0]>} : vector<24x8x32xf32>, vector<24x32x8xf32>, vector<24x8x8xf32> -> vector<24x8x8xf32>
    "tpu.trace_stop"() : () -> ()
    %c0_13 = arith.constant 0 : index
    %c0_14 = arith.constant 0 : index
    %c0_15 = arith.constant 0 : index
    %15 = vector.load %arg2[%c0_13, %c0_14, %c0_15] : memref<24x1x8xf32, #tpu.memory_space<vmem>>, vector<24x1x8xf32>
    %16 = vector.broadcast %15 : vector<24x1x8xf32> to vector<24x8x8xf32>
    %17 = arith.addf %14, %16 : vector<24x8x8xf32>
    %18 = vector.extract_strided_slice %17 {offsets = [0, 0, 0], sizes = [8, 8, 8], strides = [1, 1, 1]} : vector<24x8x8xf32> to vector<8x8x8xf32>
    %19 = vector.extract_strided_slice %17 {offsets = [8, 0, 0], sizes = [8, 8, 8], strides = [1, 1, 1]} : vector<24x8x8xf32> to vector<8x8x8xf32>
    %20 = vector.extract_strided_slice %17 {offsets = [16, 0, 0], sizes = [8, 8, 8], strides = [1, 1, 1]} : vector<24x8x8xf32> to vector<8x8x8xf32>
    "tpu.trace_start"() <{level = 10 : i32, message = "nqd,nkd->nqk"}> : () -> ()
    %cst_16 = arith.constant dense<0.000000e+00> : vector<8x8x8xf32>
    %21 = tpu.matmul %18, %19, %cst_16 {dimension_numbers = #tpu.dot_dimension_numbers<[2], [2], [1], [1], [0, 0, 0, 1, 1, 1], [0], [0]>} : vector<8x8x8xf32>, vector<8x8x8xf32>, vector<8x8x8xf32> -> vector<8x8x8xf32>
    "tpu.trace_stop"() : () -> ()
    %cst_17 = arith.constant dense<0xFF800000> : vector<8x8xf32>
    %22 = vector.multi_reduction <maximumf>, %21, %cst_17 [2] : vector<8x8x8xf32> to vector<8x8xf32>
    %23 = vector.shape_cast %22 : vector<8x8xf32> to vector<8x8x1xf32>
    %24 = vector.broadcast %23 : vector<8x8x1xf32> to vector<8x8x8xf32>
    %25 = arith.subf %21, %24 : vector<8x8x8xf32>
    %26 = math.exp %25 : vector<8x8x8xf32>
    %cst_18 = arith.constant dense<0.000000e+00> : vector<8x8xf32>
    %27 = vector.multi_reduction <add>, %26, %cst_18 [2] : vector<8x8x8xf32> to vector<8x8xf32>
    %28 = vector.shape_cast %27 : vector<8x8xf32> to vector<8x8x1xf32>
    %29 = vector.broadcast %28 : vector<8x8x1xf32> to vector<8x8x8xf32>
    %30 = arith.divf %26, %29 : vector<8x8x8xf32>
    "tpu.trace_start"() <{level = 10 : i32, message = "nqk,nkd->nqd"}> : () -> ()
    %cst_19 = arith.constant dense<0.000000e+00> : vector<8x8x8xf32>
    %31 = tpu.matmul %30, %20, %cst_19 {dimension_numbers = #tpu.dot_dimension_numbers<[2], [1], [1], [2], [0, 0, 0, 1, 1, 2], [0], [0]>} : vector<8x8x8xf32>, vector<8x8x8xf32>, vector<8x8x8xf32> -> vector<8x8x8xf32>
    "tpu.trace_stop"() : () -> ()
    %32 = vector.shape_cast %31 : vector<8x8x8xf32> to vector<4x16x8xf32>
    %c0_20 = arith.constant 0 : index
    %c0_21 = arith.constant 0 : index
    %c0_22 = arith.constant 0 : index
    %33 = vector.load %arg3[%c0_20, %c0_21, %c0_22] : memref<4x8x32xf32, #tpu.memory_space<vmem>>, vector<4x8x32xf32>
    "tpu.trace_start"() <{level = 10 : i32, message = "hmd,hdo->hmo"}> : () -> ()
    %cst_23 = arith.constant dense<0.000000e+00> : vector<4x16x32xf32>
    %34 = tpu.matmul %32, %33, %cst_23 {dimension_numbers = #tpu.dot_dimension_numbers<[2], [1], [1], [2], [0, 0, 0, 1, 1, 2], [0], [0]>} : vector<4x16x8xf32>, vector<4x8x32xf32>, vector<4x16x32xf32> -> vector<4x16x32xf32>
    "tpu.trace_stop"() : () -> ()
    %cst_24 = arith.constant dense<0.000000e+00> : vector<16x32xf32>
    %35 = vector.multi_reduction <add>, %34, %cst_24 [0] : vector<4x16x32xf32> to vector<16x32xf32>
    %36 = vector.broadcast %2 : vector<1x32xf32> to vector<16x32xf32>
    %37 = arith.addf %35, %36 : vector<16x32xf32>
    %38 = arith.addf %1, %37 : vector<16x32xf32>
    %cst_25 = arith.constant dense<0.000000e+00> : vector<16xf32>
    %39 = vector.multi_reduction <add>, %38, %cst_25 [1] : vector<16x32xf32> to vector<16xf32>
    %40 = vector.shape_cast %39 : vector<16xf32> to vector<16x1xf32>
    %cst_26 = arith.constant 3.200000e+01 : f32
    %41 = vector.broadcast %cst_26 : f32 to vector<16x1xf32>
    %42 = arith.divf %40, %41 : vector<16x1xf32>
    %43 = vector.broadcast %42 : vector<16x1xf32> to vector<16x32xf32>
    %44 = arith.subf %38, %43 : vector<16x32xf32>
    %45 = arith.mulf %44, %44 : vector<16x32xf32>
    %cst_27 = arith.constant dense<0.000000e+00> : vector<16xf32>
    %46 = vector.multi_reduction <add>, %45, %cst_27 [1] : vector<16x32xf32> to vector<16xf32>
    %47 = vector.shape_cast %46 : vector<16xf32> to vector<16x1xf32>
    %cst_28 = arith.constant 3.200000e+01 : f32
    %48 = vector.broadcast %cst_28 : f32 to vector<16x1xf32>
    %49 = arith.divf %47, %48 : vector<16x1xf32>
    %50 = vector.broadcast %42 : vector<16x1xf32> to vector<16x32xf32>
    %51 = arith.subf %38, %50 : vector<16x32xf32>
    %cst_29 = arith.constant 9.99999974E-6 : f32
    %52 = vector.broadcast %cst_29 : f32 to vector<16x1xf32>
    %53 = arith.addf %49, %52 : vector<16x1xf32>
    %54 = math.rsqrt %53 : vector<16x1xf32>
    %55 = vector.broadcast %54 : vector<16x1xf32> to vector<16x32xf32>
    %56 = arith.mulf %51, %55 : vector<16x32xf32>
    %57 = vector.broadcast %3 : vector<1x32xf32> to vector<16x32xf32>
    %58 = arith.mulf %56, %57 : vector<16x32xf32>
    %59 = vector.broadcast %4 : vector<1x32xf32> to vector<16x32xf32>
    %60 = arith.addf %58, %59 : vector<16x32xf32>
    %c0_30 = arith.constant 0 : index
    %c0_31 = arith.constant 0 : index
    %61 = vector.load %arg4[%c0_30, %c0_31] : memref<32x64xf32, #tpu.memory_space<vmem>>, vector<32x64xf32>
    %cst_32 = arith.constant dense<0.000000e+00> : vector<16x64xf32>
    %62 = tpu.matmul %60, %61, %cst_32 {dimension_numbers = #tpu.dot_dimension_numbers<[1], [0], [0], [1], [0, 0, 1, 1], [], []>} : vector<16x32xf32>, vector<32x64xf32>, vector<16x64xf32> -> vector<16x64xf32>
    %63 = vector.broadcast %5 : vector<1x64xf32> to vector<16x64xf32>
    %64 = arith.addf %62, %63 : vector<16x64xf32>
    %cst_33 = arith.constant 0.000000e+00 : f32
    %65 = vector.broadcast %cst_33 : f32 to vector<16x64xf32>
    %66 = arith.maximumf %64, %65 : vector<16x64xf32>
    %c0_34 = arith.constant 0 : index
    %c0_35 = arith.constant 0 : index
    %67 = vector.load %arg5[%c0_34, %c0_35] : memref<64x32xf32, #tpu.memory_space<vmem>>, vector<64x32xf32>
    %cst_36 = arith.constant dense<0.000000e+00> : vector<16x32xf32>
    %68 = tpu.matmul %66, %67, %cst_36 {dimension_numbers = #tpu.dot_dimension_numbers<[1], [0], [0], [1], [0, 0, 1, 1], [], []>} : vector<16x64xf32>, vector<64x32xf32>, vector<16x32xf32> -> vector<16x32xf32>
    %69 = vector.broadcast %6 : vector<1x32xf32> to vector<16x32xf32>
    %70 = arith.addf %68, %69 : vector<16x32xf32>
    %71 = arith.addf %60, %70 : vector<16x32xf32>
    %cst_37 = arith.constant dense<0.000000e+00> : vector<16xf32>
    %72 = vector.multi_reduction <add>, %71, %cst_37 [1] : vector<16x32xf32> to vector<16xf32>
    %73 = vector.shape_cast %72 : vector<16xf32> to vector<16x1xf32>
    %cst_38 = arith.constant 3.200000e+01 : f32
    %74 = vector.broadcast %cst_38 : f32 to vector<16x1xf32>
    %75 = arith.divf %73, %74 : vector<16x1xf32>
    %76 = vector.broadcast %75 : vector<16x1xf32> to vector<16x32xf32>
    %77 = arith.subf %71, %76 : vector<16x32xf32>
    %78 = arith.mulf %77, %77 : vector<16x32xf32>
    %cst_39 = arith.constant dense<0.000000e+00> : vector<16xf32>
    %79 = vector.multi_reduction <add>, %78, %cst_39 [1] : vector<16x32xf32> to vector<16xf32>
    %80 = vector.shape_cast %79 : vector<16xf32> to vector<16x1xf32>
    %cst_40 = arith.constant 3.200000e+01 : f32
    %81 = vector.broadcast %cst_40 : f32 to vector<16x1xf32>
    %82 = arith.divf %80, %81 : vector<16x1xf32>
    %83 = vector.broadcast %75 : vector<16x1xf32> to vector<16x32xf32>
    %84 = arith.subf %71, %83 : vector<16x32xf32>
    %cst_41 = arith.constant 9.99999974E-6 : f32
    %85 = vector.broadcast %cst_41 : f32 to vector<16x1xf32>
    %86 = arith.addf %82, %85 : vector<16x1xf32>
    %87 = math.rsqrt %86 : vector<16x1xf32>
    %88 = vector.broadcast %87 : vector<16x1xf32> to vector<16x32xf32>
    %89 = arith.mulf %84, %88 : vector<16x32xf32>
    %90 = vector.broadcast %7 : vector<1x32xf32> to vector<16x32xf32>
    %91 = arith.mulf %89, %90 : vector<16x32xf32>
    %92 = vector.broadcast %8 : vector<1x32xf32> to vector<16x32xf32>
    %93 = arith.addf %91, %92 : vector<16x32xf32>
    %c0_42 = arith.constant 0 : index
    %c0_43 = arith.constant 0 : index
    %94 = vector.load %arg7[%c0_42, %c0_43] : memref<16x32xf32, #tpu.memory_space<vmem>>, vector<16x32xf32>
    tpu.vector_store %arg7[%c0_42, %c0_43], %93 {strides = array<i32>} : memref<16x32xf32, #tpu.memory_space<vmem>>, vector<16x32xf32>,
    return
  }
}

</mosaic_0001>

<bundles_post_ra>
// kernel: tpu_custom_call.1
= control target key start
LH: loop header
LB: loop body
LE: loop exit
PB: predicated region body
PF: predicated region fallthrough
CT: control target
= control target key end

     0   :  { %vm228_vm0 = vcmask 261120   ;;  %s2530_s0 = inlined_call_operand.vmem [shape: f32[2,8,32], index: 0, kind: input, shape index: {}]   ;;  %s2531_s1 = inlined_call_operand.vmem [shape: f32[24,32,8], index: 1, kind: input, shape index: {}]   ;;  %s2532_s2 = inlined_call_operand.vmem [shape: f32[24,1,8], index: 2, kind: input, shape index: {}]   ;;  %s2533_s3 = inlined_call_operand.vmem [shape: f32[4,8,32], index: 3, kind: input, shape index: {}]   ;;  %s2534_s4 = inlined_call_operand.vmem [shape: f32[32,64], index: 4, kind: input, shape index: {}]   ;;  %s2535_s5 = inlined_call_operand.vmem [shape: f32[64,32], index: 5, kind: input, shape index: {}]   ;;  %s2536_s6 = inlined_call_operand.vmem [shape: f32[8,64], index: 6, kind: input, shape index: {}]   ;;  %s2537_s7 = inlined_call_operand.hbm [shape: f32[16,32], index: 7, kind: output, shape index: {}]  }
   0x1   :  { %v39_v0 = vld [vmem:[%s2531_s1 + $0x18] sm:$0xff]  ;;  %v38_v4 = vld [vmem:[%s2531_s1 + $0x10] sm:$0xff]  ;;  %v37_v8 = vld [vmem:[%s2531_s1 + $0x8] sm:$0xff] }
   0x2   :  { %v43_v1 = vld [vmem:[%s2531_s1 + $0x38] sm:$0xff]  ;;  %244 = vmatpush.msra.mxu2 %v39_v0  ;;  %v42_v5 = vld [vmem:[%s2531_s1 + $0x30] sm:$0xff]  ;;  %v41_v9 = vld [vmem:[%s2531_s1 + $0x28] sm:$0xff] }
   0x3   :  { %v55_v2 = vld [vmem:[%s2531_s1 + $0x98] sm:$0xff]  ;;  %267 = vmatpush.msra.mxu3 %v43_v1  ;;  %v54_v6 = vld [vmem:[%s2531_s1 + $0x90] sm:$0xff]  ;;  %v53_v10 = vld [vmem:[%s2531_s1 + $0x88] sm:$0xff] }
   0x4   :  { %v59_v3 = vld [vmem:[%s2531_s1 + $0xb8] sm:$0xff]  ;;  %327 = vmatpush.msra.mxu0 %v55_v2  ;;  %v58_v7 = vld [vmem:[%s2531_s1 + $0xb0] sm:$0xff]  ;;  %245 = vmatpush.msra.mxu2 %v38_v4  ;;  %v57_v11 = vld [vmem:[%s2531_s1 + $0xa8] sm:$0xff] }
   0x5   :  { %347 = vmatpush.msra.mxu1 %v59_v3  ;;  %268 = vmatpush.msra.mxu3 %v42_v5  ;;  %v36_v12 = vld [vmem:[%s2531_s1] sm:$0xff]  ;;  %v1908_v17 = vld [vmem:[%s2530_s0 + $0x8] sm:$0xff]  ;;  %v47_v18 = vld [vmem:[%s2531_s1 + $0x58] sm:$0xff] }
   0x6   :  { %328 = vmatpush.msra.mxu0 %v54_v6  ;;  %v40_v13 = vld [vmem:[%s2531_s1 + $0x20] sm:$0xff]  ;;  %246 = vmatpush.msra.mxu2 %v37_v8  ;;  %v51_v19 = vld [vmem:[%s2531_s1 + $0x78] sm:$0xff]  ;;  %v46_v22 = vld [vmem:[%s2531_s1 + $0x50] sm:$0xff] }
   0x7   :  { %348 = vmatpush.msra.mxu1 %v58_v7  ;;  %269 = vmatpush.msra.mxu3 %v41_v9  ;;  %v52_v14 = vld [vmem:[%s2531_s1 + $0x80] sm:$0xff]  ;;  %v71_v20 = vld [vmem:[%s2531_s1 + $0x118] sm:$0xff]  ;;  %v50_v23 = vld [vmem:[%s2531_s1 + $0x70] sm:$0xff] }
   0x8   :  { %v56_v15 = vld [vmem:[%s2531_s1 + $0xa0] sm:$0xff]  ;;  %329 = vmatpush.msra.mxu0 %v53_v10  ;;  %247 = vmatpush.msra.mxu2 %v36_v12  ;;  %v75_v21 = vld [vmem:[%s2531_s1 + $0x138] sm:$0xff]  ;;  %v70_v24 = vld [vmem:[%s2531_s1 + $0x110] sm:$0xff] }
   0x9   :  { %349 = vmatpush.msra.mxu1 %v57_v11  ;;  %v1903_v16 = vld [vmem:[%s2530_s0] sm:$0xff]  ;;  %270 = vmatpush.msra.mxu3 %v40_v13  ;;  %v74_v25 = vld [vmem:[%s2531_s1 + $0x130] sm:$0xff]  ;;  %v45_v26 = vld [vmem:[%s2531_s1 + $0x48] sm:$0xff] }
   0xa   :  { %330 = vmatpush.msra.mxu0 %v52_v14  ;;  %1643 = vmatmul.msk.f32.vlgmr.msra.gmra.mxu2 %vm228_vm0, %v1903_v16  ;;  %v49_v27 = vld [vmem:[%s2531_s1 + $0x68] sm:$0xff]  ;;  %v44_v30 = vld [vmem:[%s2531_s1 + $0x40] sm:$0xff]  ;;  %v63_v34 = vld [vmem:[%s2531_s1 + $0xd8] sm:$0xff] }
   0xb   :  { %350 = vmatpush.msra.mxu1 %v56_v15  ;;  %1644 = vmatmul.msk.f32.vlgmr.msra.gmra.mxu3 %vm228_vm0, %v1908_v17  ;;  %v69_v28 = vld [vmem:[%s2531_s1 + $0x108] sm:$0xff]  ;;  %v48_v31 = vld [vmem:[%s2531_s1 + $0x60] sm:$0xff]  ;;  %v67_v35 = vld [vmem:[%s2531_s1 + $0xf8] sm:$0xff] }
   0xc   :  { %1647 = vmatmul.msk.f32.vlgmr.msra.gmra.mxu0 %vm228_vm0, %v1903_v16  ;;  %1648 = vmatmul.msk.f32.vlgmr.msra.gmra.mxu1 %vm228_vm0, %v1908_v17  ;;  %v73_v29 = vld [vmem:[%s2531_s1 + $0x128] sm:$0xff]  ;;  %v68_v32 = vld [vmem:[%s2531_s1 + $0x100] sm:$0xff]  ;;  %v87_v36 = vld [vmem:[%s2531_s1 + $0x198] sm:$0xff] }
   0xd   :  { %287 = vmatpush.msrb.mxu2 %v47_v18  ;;  %307 = vmatpush.msrb.mxu3 %v51_v19  ;;  %v72_v33 = vld [vmem:[%s2531_s1 + $0x120] sm:$0xff]  ;;  %v91_v37 = vld [vmem:[%s2531_s1 + $0x1b8] sm:$0xff]  ;;  %v62_v38 = vld [vmem:[%s2531_s1 + $0xd0] sm:$0xff] }
   0xe   :  { %407 = vmatpush.msrb.mxu0 %v71_v20  ;;  %427 = vmatpush.msrb.mxu1 %v75_v21  ;;  %v66_v39 = vld [vmem:[%s2531_s1 + $0xf0] sm:$0xff]  ;;  %v61_v42 = vld [vmem:[%s2531_s1 + $0xc8] sm:$0xff]  ;;  %v60_v46 = vld [vmem:[%s2531_s1 + $0xc0] sm:$0xff] }
   0xf   :  { %288 = vmatpush.msrb.mxu2 %v46_v22  ;;  %308 = vmatpush.msrb.mxu3 %v50_v23  ;;  %v86_v40 = vld [vmem:[%s2531_s1 + $0x190] sm:$0xff]  ;;  %v65_v43 = vld [vmem:[%s2531_s1 + $0xe8] sm:$0xff]  ;;  %v64_v47 = vld [vmem:[%s2531_s1 + $0xe0] sm:$0xff] }
  0x10   :  { %408 = vmatpush.msrb.mxu0 %v70_v24  ;;  %428 = vmatpush.msrb.mxu1 %v74_v25  ;;  %v90_v41 = vld [vmem:[%s2531_s1 + $0x1b0] sm:$0xff]  ;;  %v85_v44 = vld [vmem:[%s2531_s1 + $0x188] sm:$0xff]  ;;  %v84_v48 = vld [vmem:[%s2531_s1 + $0x180] sm:$0xff] }
  0x11   :  { %289 = vmatpush.msrb.mxu2 %v45_v26  ;;  %309 = vmatpush.msrb.mxu3 %v49_v27  ;;  %v89_v45 = vld [vmem:[%s2531_s1 + $0x1a8] sm:$0xff]  ;;  %v79_v49 = vld [vmem:[%s2531_s1 + $0x158] sm:$0xff]  ;;  %v88_v51 = vld [vmem:[%s2531_s1 + $0x1a0] sm:$0xff] }
  0x12   :  { %409 = vmatpush.msrb.mxu0 %v69_v28  ;;  %429 = vmatpush.msrb.mxu1 %v73_v29  ;;  %v83_v50 = vld [vmem:[%s2531_s1 + $0x178] sm:$0xff]  ;;  %v78_v53 = vld [vmem:[%s2531_s1 + $0x150] sm:$0xff]  ;;  %v77_v56 = vld [vmem:[%s2531_s1 + $0x148] sm:$0xff] }
  0x13   :  { %290 = vmatpush.msrb.mxu2 %v44_v30  ;;  %310 = vmatpush.msrb.mxu3 %v48_v31  ;;  %v103_v52 = vld [vmem:[%s2531_s1 + $0x218] sm:$0xff]  ;;  %v82_v54 = vld [vmem:[%s2531_s1 + $0x170] sm:$0xff]  ;;  %v81_v57 = vld [vmem:[%s2531_s1 + $0x168] sm:$0xff] }
  0x14   :  { %410 = vmatpush.msrb.mxu0 %v68_v32  ;;  %430 = vmatpush.msrb.mxu1 %v72_v33  ;;  %v102_v55 = vld [vmem:[%s2531_s1 + $0x210] sm:$0xff]  ;;  %v107_v58 = vld [vmem:[%s2531_s1 + $0x238] sm:$0xff]  ;;  %v101_v59 = vld [vmem:[%s2531_s1 + $0x208] sm:$0xff] }
  0x15   :  { %1645 = vmatmul.msk.f32.vlgmr.msrb.gmra.mxu2 %vm228_vm0, %v1903_v16  ;;  %1646 = vmatmul.msk.f32.vlgmr.msrb.gmra.mxu3 %vm228_vm0, %v1908_v17  ;;  %v76_v60 = vld [vmem:[%s2531_s1 + $0x140] sm:$0xff]  ;;  %v95_v62 = vld [vmem:[%s2531_s1 + $0x1d8] sm:$0xff] }
  0x16   :  { %1651 = vmatmul.msk.f32.vlgmr.msrb.gmra.mxu0 %vm228_vm0, %v1903_v16  ;;  %1652 = vmatmul.msk.f32.vlgmr.msrb.gmra.mxu1 %vm228_vm0, %v1908_v17  ;;  %v80_v61 = vld [vmem:[%s2531_s1 + $0x160] sm:$0xff]  ;;  %v99_v63 = vld [vmem:[%s2531_s1 + $0x1f8] sm:$0xff] }
  0x17   :  { %367 = vmatpush.msra.mxu2 %v63_v34  ;;  %387 = vmatpush.msra.mxu3 %v67_v35 }
  0x18   :  { %487 = vmatpush.msra.mxu0 %v87_v36  ;;  %507 = vmatpush.msra.mxu1 %v91_v37 }
  0x19   :  { %368 = vmatpush.msra.mxu2 %v62_v38  ;;  %388 = vmatpush.msra.mxu3 %v66_v39 }
  0x1a   :  { %488 = vmatpush.msra.mxu0 %v86_v40  ;;  %508 = vmatpush.msra.mxu1 %v90_v41 }
  0x1b   :  { %369 = vmatpush.msra.mxu2 %v61_v42  ;;  %389 = vmatpush.msra.mxu3 %v65_v43 }
  0x1c   :  { %489 = vmatpush.msra.mxu0 %v85_v44  ;;  %509 = vmatpush.msra.mxu1 %v89_v45 }
  0x1d   :  { %370 = vmatpush.msra.mxu2 %v60_v46  ;;  %390 = vmatpush.msra.mxu3 %v64_v47 }
  0x1e   :  { %490 = vmatpush.msra.mxu0 %v84_v48  ;;  %1649 = vmatmul.msk.f32.vlgmr.msra.gmra.mxu2 %vm228_vm0, %v1903_v16 }
  0x1f   :  { %1650 = vmatmul.msk.f32.vlgmr.msra.gmra.mxu3 %vm228_vm0, %v1908_v17  ;;  %1655 = vmatmul.msk.f32.vlgmr.msra.gmra.mxu0 %vm228_vm0, %v1903_v16 }
  0x20   :  { %447 = vmatpush.msrb.mxu2 %v79_v49  ;;  %467 = vmatpush.msrb.mxu3 %v83_v50 }
  0x21   :  { %510 = vmatpush.msra.mxu1 %v88_v51  ;;  %567 = vmatpush.msrb.mxu0 %v103_v52 }
  0x22   :  { %448 = vmatpush.msrb.mxu2 %v78_v53  ;;  %468 = vmatpush.msrb.mxu3 %v82_v54 }
  0x23   :  { %1656 = vmatmul.msk.f32.vlgmr.msra.gmra.mxu1 %vm228_vm0, %v1908_v17  ;;  %568 = vmatpush.msrb.mxu0 %v102_v55 }
  0x24   :  { %449 = vmatpush.msrb.mxu2 %v77_v56  ;;  %469 = vmatpush.msrb.mxu3 %v81_v57 }
  0x25   :  { %587 = vmatpush.msrb.mxu1 %v107_v58  ;;  %569 = vmatpush.msrb.mxu0 %v101_v59 }
  0x26   :  { %12 = vsyncpa [#allocation3], 0  ;;  %450 = vmatpush.msrb.mxu2 %v76_v60  ;;  %470 = vmatpush.msrb.mxu3 %v80_v61  ;;  %v106_v0 = vld [vmem:[%s2531_s1 + $0x230] sm:$0xff]  ;;  %v100_v1 = vld [vmem:[%s2531_s1 + $0x200] sm:$0xff]  ;;  %vm715_vm1 = vcmask 64512   ;;  %s1809_s30 = smov [#allocation2]  }
  0x27   :  { %1653 = vmatmul.msk.f32.vlgmr.msrb.gmra.mxu2 %vm228_vm0, %v1903_v16  ;;  %1654 = vmatmul.msk.f32.vlgmr.msrb.gmra.mxu3 %vm228_vm0, %v1908_v17  ;;  %v94_v2 = vld [vmem:[%s2531_s1 + $0x1d0] sm:$0xff]  ;;  %v105_v4 = vld [vmem:[%s2531_s1 + $0x228] sm:$0xff]  ;;  %v104_v7 = vld [vmem:[%s2531_s1 + $0x220] sm:$0xff]  ;;  %s1629_s8 = sshll.u32 %s1809_s30, 4  ;;  %s1631_s11 = sshll.u32 %s2537_s7, 4  ;;  %s1630_s8 = int_to_ptr.vmem [resolvable:$true] %s1629_s8  ;;  %s1632_s11 = int_to_ptr.hbm [resolvable:$true] %s1631_s11 }
  0x28   :  { %v98_v3 = vld [vmem:[%s2531_s1 + $0x1f0] sm:$0xff]  ;;  %527 = vmatpush.msra.mxu2 %v95_v62  ;;  %547 = vmatpush.msra.mxu3 %v99_v63  ;;  %v93_v5 = vld [vmem:[%s2531_s1 + $0x1c8] sm:$0xff]  ;;  %v119_v8 = vld [vmem:[%s2531_s1 + $0x298] sm:$0xff]  ;;  %s1811_s12 = smov 8  }
  0x29   :  { %v97_v6 = vld [vmem:[%s2531_s1 + $0x1e8] sm:$0xff]  ;;  %588 = vmatpush.msrb.mxu1 %v106_v0  ;;  %570 = vmatpush.msrb.mxu0 %v100_v1  ;;  %v92_v9 = vld [vmem:[%s2531_s1 + $0x1c0] sm:$0xff]  ;;  %v123_v11 = vld [vmem:[%s2531_s1 + $0x2b8] sm:$0xff] }
  0x2a   :  { %528 = vmatpush.msra.mxu2 %v94_v2  ;;  %548 = vmatpush.msra.mxu3 %v98_v3  ;;  %v96_v10 = vld [vmem:[%s2531_s1 + $0x1e0] sm:$0xff]  ;;  %v118_v12 = vld [vmem:[%s2531_s1 + $0x290] sm:$0xff]  ;;  %v117_v14 = vld [vmem:[%s2531_s1 + $0x288] sm:$0xff] }
  0x2b   :  { %589 = vmatpush.msrb.mxu1 %v105_v4  ;;  %1659 = vmatmul.msk.f32.vlgmr.msrb.gmra.mxu0 %vm228_vm0, %v1903_v16  ;;  %v122_v13 = vld [vmem:[%s2531_s1 + $0x2b0] sm:$0xff]  ;;  %v121_v15 = vld [vmem:[%s2531_s1 + $0x2a8] sm:$0xff]  ;;  %v116_v18 = vld [vmem:[%s2531_s1 + $0x280] sm:$0xff] }
  0x2c   :  { %529 = vmatpush.msra.mxu2 %v93_v5  ;;  %549 = vmatpush.msra.mxu3 %v97_v6  ;;  %v120_v19 = vld [vmem:[%s2531_s1 + $0x2a0] sm:$0xff]  ;;  %v111_v20 = vld [vmem:[%s2531_s1 + $0x258] sm:$0xff]  ;;  %v110_v22 = vld [vmem:[%s2531_s1 + $0x250] sm:$0xff] }
  0x2d   :  { %590 = vmatpush.msrb.mxu1 %v104_v7  ;;  %647 = vmatpush.msra.mxu0 %v119_v8  ;;  %v115_v21 = vld [vmem:[%s2531_s1 + $0x278] sm:$0xff]  ;;  %v114_v23 = vld [vmem:[%s2531_s1 + $0x270] sm:$0xff]  ;;  %v109_v24 = vld [vmem:[%s2531_s1 + $0x248] sm:$0xff] }
  0x2e   :  { %530 = vmatpush.msra.mxu2 %v92_v9  ;;  %550 = vmatpush.msra.mxu3 %v96_v10  ;;  %v113_v25 = vld [vmem:[%s2531_s1 + $0x268] sm:$0xff]  ;;  %v108_v26 = vld [vmem:[%s2531_s1 + $0x240] sm:$0xff]  ;;  %v127_v28 = vld [vmem:[%s2531_s1 + $0x2d8] sm:$0xff] }
  0x2f   :  { %1657 = vmatmul.msk.f32.vlgmr.msra.gmra.mxu2 %vm228_vm0, %v1903_v16  ;;  %1658 = vmatmul.msk.f32.vlgmr.msra.gmra.mxu3 %vm228_vm0, %v1908_v17  ;;  %v112_v27 = vld [vmem:[%s2531_s1 + $0x260] sm:$0xff]  ;;  %v131_v29 = vld [vmem:[%s2531_s1 + $0x2f8] sm:$0xff]  ;;  %v126_v30 = vld [vmem:[%s2531_s1 + $0x2d0] sm:$0xff] }
  0x30   :  { %1660 = vmatmul.msk.f32.vlgmr.msrb.gmra.mxu1 %vm228_vm0, %v1908_v17  ;;  %648 = vmatpush.msra.mxu0 %v118_v12  ;;  %v130_v31 = vld [vmem:[%s2531_s1 + $0x2f0] sm:$0xff]  ;;  %v125_v32 = vld [vmem:[%s2531_s1 + $0x2c8] sm:$0xff]  ;;  %v124_v34 = vld [vmem:[%s2531_s1 + $0x2c0] sm:$0xff] }
  0x31   :  { %667 = vmatpush.msra.mxu1 %v123_v11  ;;  %607 = vmatpush.msrb.mxu2 %v111_v20  ;;  %v129_v33 = vld [vmem:[%s2531_s1 + $0x2e8] sm:$0xff]  ;;  %v128_v35 = vld [vmem:[%s2531_s1 + $0x2e0] sm:$0xff]  ;;  %v1723_v62 = vld [vmem:[%s2532_s2 + $0x10] ss:$0 sm:$0xff] }
  0x32   :  { %649 = vmatpush.msra.mxu0 %v117_v14  ;;  %627 = vmatpush.msrb.mxu3 %v115_v21  ;;  %v1711_v40 = vld [vmem:[%s2532_s2 + $0x8] ss:$0 sm:$0xff]  ;;  %v1712_v41 = vld [vmem:[%s2532_s2 + $0x9] ss:$0 sm:$0xff]  ;;  %v1710_v42 = vld [vmem:[%s2532_s2 + $0x1] ss:$0 sm:$0xff] }
  0x33   :  { %668 = vmatpush.msra.mxu1 %v122_v13  ;;  %608 = vmatpush.msrb.mxu2 %v110_v22  ;;  %v1715_v50 = vld [vmem:[%s2532_s2 + $0xc] ss:$0 sm:$0xff]  ;;  %v1707_v51 = vld [vmem:[%s2532_s2 + $0x4] ss:$0 sm:$0xff]  ;;  %v1720_v54 = vld [vmem:[%s2532_s2 + $0xd] ss:$0 sm:$0xff] }
  0x34   :  { %650 = vmatpush.msra.mxu0 %v116_v18  ;;  %628 = vmatpush.msrb.mxu3 %v114_v23  ;;  %v1708_v56 = vld [vmem:[%s2532_s2 + $0x5] ss:$0 sm:$0xff]  ;;  %v1718_v63 = vld [vmem:[%s2532_s2 + $0xa] ss:$0 sm:$0xff]  ;;  %v1719_v0 = vld [vmem:[%s2532_s2 + $0xb] ss:$0 sm:$0xff] }
  0x35   :  { %669 = vmatpush.msra.mxu1 %v121_v15  ;;  %1663 = vmatmul.msk.f32.vlgmr.msra.gmra.mxu0 %vm228_vm0, %v1903_v16  ;;  %v1713_v3 = vld [vmem:[%s2532_s2 + $0x2] ss:$0 sm:$0xff]  ;;  %v1714_v4 = vld [vmem:[%s2532_s2 + $0x3] ss:$0 sm:$0xff]  ;;  %v1724_v7 = vld [vmem:[%s2532_s2 + $0x11] ss:$0 sm:$0xff] }
  0x36   :  { %609 = vmatpush.msrb.mxu2 %v109_v24  ;;  %629 = vmatpush.msrb.mxu3 %v113_v25  ;;  %v1721_v14 = vld [vmem:[%s2532_s2 + $0xe] ss:$0 sm:$0xff]  ;;  %v1722_v15 = vld [vmem:[%s2532_s2 + $0xf] ss:$0 sm:$0xff]  ;;  %v1716_v18 = vld [vmem:[%s2532_s2 + $0x6] ss:$0 sm:$0xff] }
  0x37   :  { %670 = vmatpush.msra.mxu1 %v120_v19  ;;  %v1717_v19 = vld [vmem:[%s2532_s2 + $0x7] ss:$0 sm:$0xff] }
  0x38   :  { %1664 = vmatmul.msk.f32.vlgmr.msra.gmra.mxu1 %vm228_vm0, %v1908_v17  ;;  %610 = vmatpush.msrb.mxu2 %v108_v26  ;;  %v1725_v26 = vld [vmem:[%s2532_s2 + $0x14] ss:$0 sm:$0xff] }
  0x39   :  { %630 = vmatpush.msrb.mxu3 %v112_v27  ;;  %1661 = vmatmul.msk.f32.vlgmr.msrb.gmra.mxu2 %vm228_vm0, %v1903_v16  ;;  %v1726_v27 = vld [vmem:[%s2532_s2 + $0x15] ss:$0 sm:$0xff] }
  0x3a   :  { %1662 = vmatmul.msk.f32.vlgmr.msrb.gmra.mxu3 %vm228_vm0, %v1908_v17  ;;  %687 = vmatpush.msra.mxu2 %v127_v28 }
  0x3b   :  { %707 = vmatpush.msra.mxu3 %v131_v29 }
  0x3c   :  { %688 = vmatpush.msra.mxu2 %v126_v30 }
  0x3d   :  { %708 = vmatpush.msra.mxu3 %v130_v31 }
  0x3e   :  { %689 = vmatpush.msra.mxu2 %v125_v32  ;;  %v1727_v32 = vld [vmem:[%s2532_s2 + $0x12] ss:$0 sm:$0xff] }
  0x3f   :  { %709 = vmatpush.msra.mxu3 %v129_v33  ;;  %v1728_v33 = vld [vmem:[%s2532_s2 + $0x13] ss:$0 sm:$0xff] }
  0x40   :  { %690 = vmatpush.msra.mxu2 %v124_v34 }
  0x41   :  { %710 = vmatpush.msra.mxu3 %v128_v35  ;;  %1665 = vmatmul.msk.f32.vlgmr.msra.gmra.mxu2 %vm228_vm0, %v1903_v16  ;;  %v1709_v16 = vld [vmem:[%s2532_s2] ss:$0 sm:$0xff] }
  0x42   :  { %1666 = vmatmul.msk.f32.vlgmr.msra.gmra.mxu3 %vm228_vm0, %v1908_v17 }
  0x89   :  { %v332_v36 = vpop.f32.mrf.mxu0  ;;  %v352_v37 = vpop.f32.mrf.mxu1 }
  0x8a   :  { %v333_v55 = vadd.f32 %v1707_v51, %v332_v36  ;;  %v353_v60 = vadd.f32 %v1708_v56, %v352_v37 }
  0x8d   :  { %v249_v38 = vpop.f32.mrf.mxu2 }
  0x8e   :  { %v272_v39 = vpop.f32.mrf.mxu3  ;;  %v250_v47 = vadd.f32 %v1709_v16, %v249_v38  ;;  %v1729_v38 = vld [vmem:[%s2532_s2 + $0x16] ss:$0 sm:$0xff] }
  0x8f   :  { %v273_v46 = vadd.f32 %v1710_v42, %v272_v39  ;;  %v1730_v39 = vld [vmem:[%s2532_s2 + $0x17] ss:$0 sm:$0xff] }
  0x93   :  { %v412_v17 = vpop.f32.mrf.mxu0  ;;  %v432_v43 = vpop.f32.mrf.mxu1 }
  0x94   :  { %v413_v44 = vadd.f32 %v1711_v40, %v412_v17  ;;  %v433_v45 = vadd.f32 %v1712_v41, %v432_v43 }
  0x96   :  { %1667 = vmatpush.xpose.msk.msrb.mxu0 %vm715_vm1, %v413_v44  ;;  %1669 = vmatpush.xpose.msk.msrb.mxu1 %vm715_vm1, %v433_v45 }
  0x98   :  { %v292_v48 = vpop.f32.mrf.mxu2  ;;  %v312_v49 = vpop.f32.mrf.mxu3 }
  0x99   :  { %1668 = vmatmul.msk.f32.vlgmr.msrb.gmra.mxu0 %vm715_vm1, %v250_v47  ;;  %1670 = vmatmul.msk.f32.vlgmr.msrb.gmra.mxu1 %vm715_vm1, %v273_v46  ;;  %v293_v11 = vadd.f32 %v1713_v3, %v292_v48  ;;  %v313_v12 = vadd.f32 %v1714_v4, %v312_v49 }
  0x9c   :  { %v492_v52 = vpop.f32.mrf.mxu0 }
  0x9d   :  { %v493_v53 = vadd.f32 %v1715_v50, %v492_v52 }
  0x9f   :  { %1675 = vmatpush.xpose.msk.msra.mxu0 %vm715_vm1, %v493_v53 }
  0xa0   :  { %v512_v57 = vpop.f32.mrf.mxu1 }
  0xa1   :  { %v372_v58 = vpop.f32.mrf.mxu2  ;;  %v513_v59 = vadd.f32 %v1720_v54, %v512_v57 }
  0xa2   :  { %v392_v61 = vpop.f32.mrf.mxu3  ;;  %1676 = vmatmul.msk.f32.vlgmr.msra.gmra.mxu0 %vm715_vm1, %v333_v55  ;;  %v373_v24 = vadd.f32 %v1716_v18, %v372_v58 }
  0xa3   :  { %1677 = vmatpush.xpose.msk.msra.mxu1 %vm715_vm1, %v513_v59  ;;  %v393_v25 = vadd.f32 %v1717_v19, %v392_v61 }
  0xa6   :  { %1678 = vmatmul.msk.f32.vlgmr.msra.gmra.mxu1 %vm715_vm1, %v353_v60 }
  0xa8   :  { %v572_v1 = vpop.f32.mrf.mxu0 }
  0xa9   :  { %v573_v2 = vadd.f32 %v1723_v62, %v572_v1 }
  0xaa   :  { %v452_v5 = vpop.f32.mrf.mxu2  ;;  %v472_v6 = vpop.f32.mrf.mxu3 }
  0xab   :  { %v453_v8 = vadd.f32 %v1718_v63, %v452_v5  ;;  %v473_v9 = vadd.f32 %v1719_v0, %v472_v6  ;;  %1134 = vmatpush.msrb.mxu0 %v573_v2 }
  0xad   :  { %1671 = vmatpush.xpose.msk.msrb.mxu2 %vm715_vm1, %v453_v8  ;;  %1673 = vmatpush.xpose.msk.msrb.mxu3 %vm715_vm1, %v473_v9  ;;  %v592_v10 = vpop.f32.mrf.mxu1 }
  0xae   :  { %v593_v13 = vadd.f32 %v1724_v7, %v592_v10 }
  0xb0   :  { %1672 = vmatmul.msk.f32.vlgmr.msrb.gmra.mxu2 %vm715_vm1, %v293_v11  ;;  %1674 = vmatmul.msk.f32.vlgmr.msrb.gmra.mxu3 %vm715_vm1, %v313_v12 }
  0xb1   :  { %1157 = vmatpush.msrb.mxu1 %v593_v13 }
  0xb2   :  { %v532_v20 = vpop.f32.mrf.mxu2  ;;  %v552_v21 = vpop.f32.mrf.mxu3 }
  0xb3   :  { %v533_v22 = vadd.f32 %v1721_v14, %v532_v20  ;;  %v553_v23 = vadd.f32 %v1722_v15, %v552_v21  ;;  %v652_v28 = vpop.f32.mrf.mxu0 }
  0xb4   :  { %v653_v30 = vadd.f32 %v1725_v26, %v652_v28 }
  0xb5   :  { %1679 = vmatpush.xpose.msk.msra.mxu2 %vm715_vm1, %v533_v22  ;;  %1681 = vmatpush.xpose.msk.msra.mxu3 %vm715_vm1, %v553_v23  ;;  %v672_v29 = vpop.f32.mrf.mxu1 }
  0xb6   :  { %v673_v31 = vadd.f32 %v1726_v27, %v672_v29  ;;  %1226 = vmatpush.msra.mxu0 %v653_v30 }
  0xb8   :  { %1680 = vmatmul.msk.f32.vlgmr.msra.gmra.mxu2 %vm715_vm1, %v373_v24  ;;  %1682 = vmatmul.msk.f32.vlgmr.msra.gmra.mxu3 %vm715_vm1, %v393_v25 }
  0xb9   :  { %1249 = vmatpush.msra.mxu1 %v673_v31 }
  0xbc   :  { %v612_v34 = vpop.f32.mrf.mxu2 }
  0xbd   :  { %v632_v35 = vpop.f32.mrf.mxu3  ;;  %v613_v36 = vadd.f32 %v1727_v32, %v612_v34 }
  0xbe   :  { %v633_v37 = vadd.f32 %v1728_v33, %v632_v35 }
  0xbf   :  { %1180 = vmatpush.msrb.mxu2 %v613_v36 }
  0xc0   :  { %1203 = vmatpush.msrb.mxu3 %v633_v37 }
  0xc4   :  { %v692_v40 = vpop.f32.mrf.mxu2 }
  0xc5   :  { %v712_v41 = vpop.f32.mrf.mxu3  ;;  %v693_v42 = vadd.f32 %v1729_v38, %v692_v40 }
  0xc6   :  { %v713_v16 = vadd.f32 %v1730_v39, %v712_v41 }
  0xc7   :  { %1272 = vmatpush.msra.mxu2 %v693_v42 }
  0xc8   :  { %1295 = vmatpush.msra.mxu3 %v713_v16 }
 0x116   :  { %v739_v17 = vpop.f32.mrf.mxu0  ;;  %v765_v43 = vpop.f32.mrf.mxu1 }
 0x117   :  { %v927_v44 = vsel %vm715_vm1, %v765_v43, -inf  ;;  %v924_v53 = vsel %vm715_vm1, %v739_v17, -inf }
 0x118   :  { %928 = vmax.xlane.f32.xlu2 %v927_v44 }
 0x11f   :  { %v843_v45 = vpop.f32.mrf.mxu0 }
 0x120   :  { %v936_v46 = vsel %vm715_vm1, %v843_v45, -inf }
 0x121   :  { %937 = vmax.xlane.f32.xlu2 %v936_v46 }
 0x123   :  { %v869_v54 = vpop.f32.mrf.mxu1 }
 0x124   :  { %v939_v56 = vsel %vm715_vm1, %v869_v54, -inf }
 0x133   :  { %v791_v47 = vpop.f32.mrf.mxu2  ;;  %v817_v48 = vpop.f32.mrf.mxu3 }
 0x134   :  { %v933_v49 = vsel %vm715_vm1, %v817_v48, -inf  ;;  %v930_v50 = vsel %vm715_vm1, %v791_v47, -inf }
 0x135   :  { %934 = vmax.xlane.f32.xlu1 %v933_v49  ;;  %931 = vmax.xlane.f32.xlu0 %v930_v50 }
 0x13b   :  { %v895_v51 = vpop.f32.mrf.mxu2  ;;  %v921_v55 = vpop.f32.mrf.mxu3 }
 0x13c   :  { %v942_v52 = vsel %vm715_vm1, %v895_v51, -inf  ;;  %v945_v57 = vsel %vm715_vm1, %v921_v55, -inf }
 0x13d   :  { %943 = vmax.xlane.f32.xlu1 %v942_v52  ;;  %925 = vmax.xlane.f32.xlu0 %v924_v53 }
 0x145   :  { %940 = vmax.xlane.f32.xlu1 %v939_v56  ;;  %946 = vmax.xlane.f32.xlu0 %v945_v57 }
 0x18b   :  { %v929_v58 = vpop.xlane.xlu2 %928 }
 0x18c   :  { %v949_v12 = vsub.f32 %v765_v43, %v929_v58 }
 0x18e   :  { %v958_v15 = vmul.f32 1.442695, %v949_v12 }
 0x194   :  { %v938_v59 = vpop.xlane.xlu2 %937 }
 0x195   :  { %v952_v0 = vsub.f32 %v843_v45, %v938_v59 }
 0x197   :  { %v964_v3 = vmul.f32 1.442695, %v952_v0 }
 0x1a8   :  { %v935_v60 = vpop.xlane.xlu1 %934  ;;  %v932_v61 = vpop.xlane.xlu0 %931 }
 0x1a9   :  { %v951_v62 = vsub.f32 %v817_v48, %v935_v60  ;;  %v950_v63 = vsub.f32 %v791_v47, %v932_v61 }
 0x1ab   :  { %v962_v1 = vmul.f32 1.442695, %v951_v62  ;;  %v960_v2 = vmul.f32 1.442695, %v950_v63 }
 0x1ad   :  { %1738 = vpow2.f32 %v962_v1 }
 0x1ae   :  { %1740 = vpow2.f32 %v960_v2 }
 0x1af   :  { %1742 = vpow2.f32 %v964_v3 }
 0x1b0   :  { %v944_v4 = vpop.xlane.xlu1 %943  ;;  %v926_v5 = vpop.xlane.xlu0 %925 }
 0x1b1   :  { %v954_v6 = vsub.f32 %v895_v51, %v944_v4  ;;  %v948_v7 = vsub.f32 %v739_v17, %v926_v5 }
 0x1b3   :  { %v2294_v8 = vpop.eup %1738  ;;  %v968_v9 = vmul.f32 1.442695, %v954_v6  ;;  %v956_v10 = vmul.f32 1.442695, %v948_v7 }
 0x1b4   :  { %v2296_v11 = vpop.eup %1740  ;;  %v981_v13 = vsel %vm715_vm1, %v2294_v8, 0.0 }
 0x1b5   :  { %1744 = vpow2.f32 %v968_v9  ;;  %982 = vadd.xlane.f32.xlu1 %v981_v13  ;;  %v978_v14 = vsel %vm715_vm1, %v2296_v11, 0.0  ;;  %v2302_v19 = vpop.eup %1742 }
 0x1b6   :  { %1746 = vpow2.f32 %v956_v10  ;;  %979 = vadd.xlane.f32.xlu2 %v978_v14  ;;  %v984_v27 = vsel %vm715_vm1, %v2302_v19, 0.0 }
 0x1b7   :  { %1748 = vpow2.f32 %v958_v15 }
 0x1b8   :  { %v947_v18 = vpop.xlane.xlu0 %946  ;;  %v941_v20 = vpop.xlane.xlu1 %940 }
 0x1b9   :  { %v955_v21 = vsub.f32 %v921_v55, %v947_v18  ;;  %v953_v25 = vsub.f32 %v869_v54, %v941_v20 }
 0x1bb   :  { %v2304_v22 = vpop.eup %1744  ;;  %v970_v23 = vmul.f32 1.442695, %v955_v21  ;;  %v966_v29 = vmul.f32 1.442695, %v953_v25 }
 0x1bc   :  { %v2306_v24 = vpop.eup %1746  ;;  %v990_v26 = vsel %vm715_vm1, %v2304_v22, 0.0 }
 0x1bd   :  { %v972_v28 = vsel %vm715_vm1, %v2306_v24, 0.0  ;;  %985 = vadd.xlane.f32.xlu1 %v984_v27  ;;  %1750 = vpow2.f32 %v970_v23  ;;  %v2314_v30 = vpop.eup %1748 }
 0x1be   :  { %973 = vadd.xlane.f32.xlu0 %v972_v28  ;;  %991 = vadd.xlane.f32.xlu2 %v990_v26  ;;  %1752 = vpow2.f32 %v966_v29  ;;  %v975_v32 = vsel %vm715_vm1, %v2314_v30, 0.0 }
 0x1c3   :  { %v2316_v31 = vpop.eup %1750 }
 0x1c4   :  { %v993_v33 = vsel %vm715_vm1, %v2316_v31, 0.0  ;;  %v2322_v34 = vpop.eup %1752 }
 0x1c5   :  { %v987_v35 = vsel %vm715_vm1, %v2322_v34, 0.0 }
 0x1c6   :  { %976 = vadd.xlane.f32.xlu0 %v975_v32  ;;  %994 = vadd.xlane.f32.xlu2 %v993_v33 }
 0x1ce   :  { %988 = vadd.xlane.f32.xlu0 %v987_v35 }
 0x228   :  { %v983_v36 = vpop.xlane.xlu1 %982 }
 0x229   :  { %1754 = vrcp.f32 %v983_v36  ;;  %v980_v37 = vpop.xlane.xlu2 %979  ;;  %v1050_v46 = vand.u32 2147483647, %v983_v36  ;;  %v1052_v47 = vand.u32 2147483648, %v983_v36  ;;  %vm1046_vm5 = vweird.f32 %v983_v36 }
 0x22a   :  { %1756 = vrcp.f32 %v980_v37  ;;  %v1035_v49 = vand.u32 2147483647, %v980_v37  ;;  %v1037_v51 = vand.u32 2147483648, %v980_v37  ;;  %vm1031_vm4 = vweird.f32 %v980_v37 }
 0x22b   :  { %vm2334_vm6 = vcmp.eq.f32.partialorder %v1050_v46, 8.507059e+37  ;;  %v1053_v59 = vor.u32 1.1754944e-38, %v1052_v47 }
 0x22c   :  { %vm1036_vm9 = vcmp.eq.f32.partialorder %v1035_v49, 8.507059e+37  ;;  %v1038_v2 = vor.u32 1.1754944e-38, %v1037_v51 }
 0x22f   :  { %v1755_v38 = vpop.eup %1754 }
 0x230   :  { %v1757_v39 = vpop.eup %1756  ;;  %v1042_v40 = vmul.f32 %v1755_v38, %v983_v36  ;;  %v2326_v41 = vpop.xlane.xlu1 %985  ;;  %vm1047_vm3 = vweird.f32 %v1755_v38 }
 0x231   :  { %v1027_v42 = vmul.f32 %v1757_v39, %v980_v37  ;;  %v974_v16 = vpop.xlane.xlu0 %973  ;;  %1758 = vrcp.f32 %v2326_v41  ;;  %v2329_v17 = vpop.xlane.xlu2 %991  ;;  %vm1032_vm2 = vweird.f32 %v1757_v39  ;;  %vm2344_vm8 = vmor %vm1046_vm5, %vm1047_vm3  ;;  %vm1061_vm11 = vweird.f32 %v2326_v41 }
 0x232   :  { %v1043_v43 = vsub.f32 1.0, %v1042_v40  ;;  %1760 = vrcp.f32 %v974_v16  ;;  %vm2338_vm7 = vmor %vm1031_vm4, %vm1032_vm2  ;;  %vm1001_vm10 = vweird.f32 %v974_v16  ;;  %v1005_v5 = vand.u32 2147483647, %v974_v16 }
 0x233   :  { %v1028_v44 = vsub.f32 1.0, %v1027_v42  ;;  %1762 = vrcp.f32 %v2329_v17  ;;  %v1007_v9 = vand.u32 2147483648, %v974_v16  ;;  %v1065_v10 = vand.u32 2147483647, %v2326_v41 }
 0x234   :  { %v1044_v45 = vmul.f32 %v1755_v38, %v1043_v43  ;;  %v1067_v18 = vand.u32 2147483648, %v2326_v41  ;;  %v1095_v20 = vand.u32 2147483647, %v2329_v17  ;;  %v1097_v21 = vand.u32 2147483648, %v2329_v17 }
 0x235   :  { %v1029_v48 = vmul.f32 %v1757_v39, %v1028_v44  ;;  %vm1006_vm15 = vcmp.eq.f32.partialorder %v1005_v5, 8.507059e+37  ;;  %v1008_v28 = vor.u32 1.1754944e-38, %v1007_v9  ;;  %vm1091_vm2 = vweird.f32 %v2329_v17  ;;  %v1300_v9 = vld [vmem:[%s2533_s3] sm:$0xff] }
 0x236   :  { %v1045_v50 = vadd.f32 %v1755_v38, %v1044_v45  ;;  %vm1096_vm5 = vcmp.eq.f32.partialorder %v1095_v20, 8.507059e+37 }
 0x237   :  { %v2332_v52 = vpop.eup %1758  ;;  %v1030_v53 = vadd.f32 %v1757_v39, %v1029_v48 }
 0x238   :  { %v1761_v54 = vpop.eup %1760  ;;  %v1057_v57 = vmul.f32 %v2332_v52, %v2326_v41  ;;  %v1049_v1 = vsel %vm2344_vm8, %v1755_v38, %v1045_v50  ;;  %vm1062_vm3 = vweird.f32 %v2332_v52  ;;  %v1068_v50 = vor.u32 1.1754944e-38, %v1067_v18 }
 0x239   :  { %v1034_v60 = vsel %vm2338_vm7, %v1757_v39, %v1030_v53  ;;  %v997_v61 = vmul.f32 %v1761_v54, %v974_v16  ;;  %v2350_v62 = vpop.xlane.xlu0 %976  ;;  %v2352_v63 = vpop.xlane.xlu2 %994  ;;  %v1054_v12 = vsel %vm2334_vm6, %v1053_v59, %v1049_v1  ;;  %vm1002_vm12 = vweird.f32 %v1761_v54  ;;  %vm2388_vm6 = vmor %vm1061_vm11, %vm1062_vm3 }
 0x23a   :  { %v1763_v0 = vpop.eup %1762  ;;  %v1058_v3 = vsub.f32 1.0, %v1057_v57  ;;  %1764 = vrcp.f32 %v2350_v62  ;;  %v1039_v7 = vsel %vm1036_vm9, %v1038_v2, %v1034_v60  ;;  %vm1003_vm14 = vmor %vm1001_vm10, %vm1002_vm12  ;;  %v1055_v29 = vmul.f32 %v2294_v8, %v1054_v12 }
 0x23b   :  { %v998_v4 = vsub.f32 1.0, %v997_v61  ;;  %v1087_v6 = vmul.f32 %v1763_v0, %v2329_v17  ;;  %1766 = vrcp.f32 %v2352_v63  ;;  %vm1092_vm13 = vweird.f32 %v1763_v0 }
 0x23c   :  { %v1059_v15 = vmul.f32 %v2332_v52, %v1058_v3  ;;  %v1040_v26 = vmul.f32 %v2296_v11, %v1039_v7  ;;  %vm1093_vm4 = vmor %vm1091_vm2, %vm1092_vm13  ;;  %v1098_v39 = vor.u32 1.1754944e-38, %v1097_v21  ;;  %1686 = vmatmul.msk.f32.vlgmr.msrb.gmra.mxu3 %vm715_vm1, %v1055_v29  ;;  %v1020_v17 = vand.u32 2147483647, %v2350_v62 }
 0x23d   :  { %v999_v13 = vmul.f32 %v1761_v54, %v998_v4  ;;  %v1088_v14 = vsub.f32 1.0, %v1087_v6  ;;  %v1022_v43 = vand.u32 2147483648, %v2350_v62  ;;  %vm1016_vm8 = vweird.f32 %v2350_v62 }
 0x23e   :  { %1685 = vmatmul.msk.f32.vlgmr.msrb.gmra.mxu2 %vm715_vm1, %v1040_v26  ;;  %v1060_v38 = vadd.f32 %v2332_v52, %v1059_v15  ;;  %v1110_v53 = vand.u32 2147483647, %v2352_v63  ;;  %vm1066_vm10 = vcmp.eq.f32.partialorder %v1065_v10, 8.507059e+37  ;;  %vm1021_vm12 = vcmp.eq.f32.partialorder %v1020_v17, 8.507059e+37  ;;  %v1302_v10 = vld [vmem:[%s2533_s3 + $0x10] sm:$0xff] }
 0x23f   :  { %v1000_v23 = vadd.f32 %v1761_v54, %v999_v13  ;;  %v1089_v25 = vmul.f32 %v1763_v0, %v1088_v14  ;;  %vm1106_vm13 = vweird.f32 %v2352_v63  ;;  %1383 = vmatpush.msrb.mxu2 %v1302_v10 }
 0x240   :  { %v1765_v27 = vpop.eup %1764  ;;  %v1064_v49 = vsel %vm2388_vm6, %v2332_v52, %v1060_v38 }
 0x241   :  { %v1004_v32 = vsel %vm1003_vm14, %v1761_v54, %v1000_v23  ;;  %v1090_v33 = vadd.f32 %v1763_v0, %v1089_v25  ;;  %v1012_v35 = vmul.f32 %v1765_v27, %v2350_v62  ;;  %v2374_v36 = vpop.xlane.xlu0 %988  ;;  %v1767_v11 = vpop.eup %1766  ;;  %vm1017_vm7 = vweird.f32 %v1765_v27 }
 0x242   :  { %v1009_v37 = vsel %vm1006_vm15, %v1008_v28, %v1004_v32  ;;  %1768 = vrcp.f32 %v2374_v36  ;;  %v1102_v42 = vmul.f32 %v1767_v11, %v2352_v63  ;;  %vm1107_vm9 = vweird.f32 %v1767_v11  ;;  %vm1018_vm11 = vmor %vm1016_vm8, %vm1017_vm7 }
 0x243   :  { %v1094_v8 = vsel %vm1093_vm4, %v1763_v0, %v1090_v33  ;;  %v1013_v40 = vsub.f32 1.0, %v1012_v35  ;;  %v1010_v44 = vmul.f32 %v2306_v24, %v1009_v37  ;;  %v1112_v24 = vand.u32 2147483648, %v2352_v63  ;;  %vm1108_vm14 = vmor %vm1106_vm13, %vm1107_vm9  ;;  %v1731_v37 = vld [vmem:[%s2536_s6] ss:$0 sm:$0xff] }
 0x244   :  { %v1099_v16 = vsel %vm1096_vm5, %v1098_v39, %v1094_v8  ;;  %v1103_v47 = vsub.f32 1.0, %v1102_v42  ;;  %v1069_v52 = vsel %vm1066_vm10, %v1068_v50, %v1064_v49  ;;  %vm1111_vm15 = vcmp.eq.f32.partialorder %v1110_v53, 8.507059e+37 }
 0x245   :  { %v1014_v46 = vmul.f32 %v1765_v27, %v1013_v40  ;;  %v1100_v48 = vmul.f32 %v2304_v22, %v1099_v16  ;;  %1683 = vmatmul.msk.f32.vlgmr.msrb.gmra.mxu0 %vm715_vm1, %v1010_v44  ;;  %v1023_v22 = vor.u32 1.1754944e-38, %v1022_v43  ;;  %v1113_v59 = vor.u32 1.1754944e-38, %v1112_v24  ;;  %v1780_v44 = vld [vmem:[%s2530_s0] sm:$0xff] }
 0x246   :  { %v1104_v51 = vmul.f32 %v1767_v11, %v1103_v47  ;;  %v1082_v1 = vand.u32 2147483648, %v2374_v36  ;;  %v1070_v63 = vmul.f32 %v2302_v19, %v1069_v52  ;;  %v1080_v3 = vand.u32 2147483647, %v2374_v36  ;;  %1325 = vmatpush.msrb.mxu0 %v1300_v9 }
 0x247   :  { %v1015_v41 = vadd.f32 %v1765_v27, %v1014_v46  ;;  %1689 = vmatmul.msk.f32.vlgmr.msra.gmra.mxu2 %vm715_vm1, %v1100_v48  ;;  %vm1076_vm3 = vweird.f32 %v2374_v36 }
 0x248   :  { %v1769_v54 = vpop.eup %1768  ;;  %v1105_v56 = vadd.f32 %v1767_v11, %v1104_v51  ;;  %vm1081_vm5 = vcmp.eq.f32.partialorder %v1080_v3, 8.507059e+37  ;;  %v1781_v51 = vld [vmem:[%s2530_s0 + $0x8] sm:$0xff] }
 0x249   :  { %v1019_v55 = vsel %vm1018_vm11, %v1765_v27, %v1015_v41  ;;  %v1072_v57 = vmul.f32 %v1769_v54, %v2374_v36  ;;  %vm1077_vm2 = vweird.f32 %v1769_v54 }
 0x24a   :  { %v1024_v58 = vsel %vm1021_vm12, %v1023_v22, %v1019_v55  ;;  %v1109_v60 = vsel %vm1108_vm14, %v1767_v11, %v1105_v56  ;;  %vm1078_vm4 = vmor %vm1076_vm3, %vm1077_vm2  ;;  %v1808_v22 = vmov 32.0   ;;  %vm1541_vm12 = vcmask 523264  }
 0x24b   :  { %v1073_v61 = vsub.f32 1.0, %v1072_v57  ;;  %v1025_v62 = vmul.f32 %v2314_v30, %v1024_v58  ;;  %v1114_v0 = vsel %vm1111_vm15, %v1113_v59, %v1109_v60  ;;  %v1083_v30 = vor.u32 1.1754944e-38, %v1082_v1 }
 0x24c   :  { %v1115_v4 = vmul.f32 %v2316_v31, %v1114_v0  ;;  %v1301_v31 = vld [vmem:[%s2533_s3 + $0x8] sm:$0xff]  ;;  %1770 = vrcp.f32 %v1808_v22  ;;  %v1735_v22 = vld [vmem:[%s2536_s6 + $0x4] ss:$0 sm:$0xff] }
 0x24d   :  { %v1074_v2 = vmul.f32 %v1769_v54, %v1073_v61  ;;  %1684 = vmatmul.msk.f32.vlgmr.msrb.gmra.mxu1 %vm715_vm1, %v1025_v62  ;;  %1687 = vmatmul.msk.f32.vlgmr.msra.gmra.mxu0 %vm715_vm1, %v1070_v63 }
 0x24e   :  { %1690 = vmatmul.msk.f32.vlgmr.msra.gmra.mxu3 %vm715_vm1, %v1115_v4  ;;  %1354 = vmatpush.msrb.mxu1 %v1301_v31 }
 0x24f   :  { %v1075_v5 = vadd.f32 %v1769_v54, %v1074_v2 }
 0x251   :  { %v1079_v6 = vsel %vm1078_vm4, %v1769_v54, %v1075_v5 }
 0x252   :  { %v1084_v19 = vsel %vm1081_vm5, %v1083_v30, %v1079_v6  ;;  %v1771_v52 = vpop.eup %1770  ;;  %v1499_v30 = vld [vmem:[%s2534_s4 + $0x18] sm:$0xff]  ;;  %v1498_v6 = vld [vmem:[%s2534_s4 + $0x10] sm:$0xff] }
 0x253   :  { %v1085_v7 = vmul.f32 %v2322_v34, %v1084_v19  ;;  %v1303_v34 = vld [vmem:[%s2533_s3 + $0x18] sm:$0xff]  ;;  %v1446_v55 = vmul.f32 32.0, %v1771_v52  ;;  %1519 = vmatpush.msra.mxu0 %v1499_v30  ;;  %v1497_v19 = vld [vmem:[%s2534_s4 + $0x8] sm:$0xff] }
 0x254   :  { %1412 = vmatpush.msrb.mxu3 %v1303_v34  ;;  %v1539_v34 = vld [vmem:[%s2535_s5 + $0x38] sm:$0xff] }
 0x255   :  { %1688 = vmatmul.msk.f32.vlgmr.msra.gmra.mxu1 %vm715_vm1, %v1085_v7  ;;  %v1447_v56 = vsub.f32 1.0, %v1446_v55  ;;  %1520 = vmatpush.msra.mxu0 %v1498_v6  ;;  %v1496_v7 = vld [vmem:[%s2534_s4] sm:$0xff] }
 0x256   :  { %1556 = vmatpush.msra.mxu1 %v1539_v34 }
 0x257   :  { %v1448_v57 = vmul.f32 %v1771_v52, %v1447_v56  ;;  %1521 = vmatpush.msra.mxu0 %v1497_v19 }
 0x259   :  { %v1449_v58 = vadd.f32 %v1771_v52, %v1448_v57  ;;  %1522 = vmatpush.msra.mxu0 %v1496_v7 }
 0x2bf   :  { %v1205_v14 = vpop.f32.mrf.mxu3 }
 0x2c1   :  { %v1182_v13 = vpop.f32.mrf.mxu2 }
 0x2c2   :  { %v1136_v12 = vpop.f32.mrf.mxu0  ;;  %1693 = vmatmul.msk.f32.vlgmr.msrb.gmra.mxu1 %vm715_vm1, %v1182_v13  ;;  %v1537_v13 = vld [vmem:[%s2535_s5 + $0x28] sm:$0xff] }
 0x2c3   :  { %1691 = vmatmul.msk.f32.vlgmr.msrb.gmra.mxu0 %vm715_vm1, %v1136_v12  ;;  %v1538_v12 = vld [vmem:[%s2535_s5 + $0x30] sm:$0xff] }
 0x2c4   :  { %1557 = vmatpush.msra.mxu1 %v1538_v12 }
 0x2c6   :  { %1558 = vmatpush.msra.mxu1 %v1537_v13 }
 0x2ca   :  { %v1159_v15 = vpop.f32.mrf.mxu1  ;;  %v1228_v18 = vpop.f32.mrf.mxu0  ;;  %1694 = vmatmul.msk.f32.gmra.mxu1 %vm715_vm1, %v1205_v14 }
 0x2cb   :  { %v1274_v20 = vpop.f32.mrf.mxu2  ;;  %1692 = vmatmul.msk.f32.gmra.mxu0 %vm715_vm1, %v1159_v15  ;;  %1695 = vmatmul.msk.f32.vlgmr.msrb.gmra.mxu2 %vm715_vm1, %v1228_v18  ;;  %v1536_v18 = vld [vmem:[%s2535_s5 + $0x20] sm:$0xff] }
 0x2cc   :  { %1697 = vmatmul.msk.f32.vlgmr.msrb.gmra.mxu3 %vm715_vm1, %v1274_v20  ;;  %1559 = vmatpush.msra.mxu1 %v1536_v18 }
 0x2d1   :  { %v1297_v21 = vpop.f32.mrf.mxu3 }
 0x2d2   :  { %v1251_v23 = vpop.f32.mrf.mxu1 }
 0x2d3   :  { %1696 = vmatmul.msk.f32.gmra.mxu2 %vm715_vm1, %v1251_v23  ;;  %v1535_v23 = vld [vmem:[%s2535_s5 + $0x18] sm:$0xff] }
 0x2d4   :  { %1698 = vmatmul.msk.f32.gmra.mxu3 %vm715_vm1, %v1297_v21  ;;  %vm1450_vm1 = vweird.f32 %v1771_v52  ;;  %1560 = vmatpush.msra.mxu1 %v1535_v23 }
 0x2d5   :  { %v2453_v59 = vsel %vm1450_vm1, %v1771_v52, %v1449_v58 }
 0x33f   :  { %v1356_v26 = vpop.f32.mrf.mxu1 }
 0x340   :  { %v1327_v25 = vpop.f32.mrf.mxu0  ;;  %v1421_v28 = vsel %vm228_vm0, %v1356_v26, 0.0 }
 0x341   :  { %v1420_v27 = vsel %vm228_vm0, %v1327_v25, 0.0 }
 0x342   :  { %v1422_v29 = vadd.f32 %v1421_v28, %v1420_v27 }
 0x347   :  { %v1359_v39 = vpop.f32.mrf.mxu1 }
 0x348   :  { %v1330_v36 = vpop.f32.mrf.mxu0  ;;  %v1428_v16 = vsel %vm228_vm0, %v1359_v39, 0.0 }
 0x349   :  { %v1427_v40 = vsel %vm228_vm0, %v1330_v36, 0.0 }
 0x34a   :  { %v1429_v17 = vadd.f32 %v1428_v16, %v1427_v40 }
 0x34e   :  { %v1385_v32 = vpop.f32.mrf.mxu2 }
 0x34f   :  { %v1414_v33 = vpop.f32.mrf.mxu3  ;;  %v1423_v35 = vsel %vm228_vm0, %v1385_v32, 0.0 }
 0x350   :  { %v1424_v11 = vadd.f32 %v1423_v35, %v1422_v29  ;;  %v1425_v38 = vsel %vm228_vm0, %v1414_v33, 0.0  ;;  %v1732_v35 = vld [vmem:[%s2536_s6 + $0x1] ss:$0 sm:$0xff] }
 0x352   :  { %v1426_v8 = vadd.f32 %v1425_v38, %v1424_v11  ;;  %v1733_v38 = vld [vmem:[%s2536_s6 + $0x2] ss:$0 sm:$0xff] }
 0x354   :  { %v1435_v42 = vadd.f32 %v1731_v37, %v1426_v8 }
 0x356   :  { %v1388_v43 = vpop.f32.mrf.mxu2  ;;  %v1437_v45 = vadd.f32 %v1780_v44, %v1435_v42 }
 0x357   :  { %v1417_v46 = vpop.f32.mrf.mxu3  ;;  %v1430_v47 = vsel %vm228_vm0, %v1388_v43, 0.0 }
 0x358   :  { %v1431_v48 = vadd.f32 %v1430_v47, %v1429_v17  ;;  %v1439_v49 = vsel %vm228_vm0, %v1437_v45, 0.0  ;;  %v1432_v50 = vsel %vm228_vm0, %v1417_v46, 0.0  ;;  %v1534_v46 = vld [vmem:[%s2535_s5 + $0x10] sm:$0xff]  ;;  %v1533_v47 = vld [vmem:[%s2535_s5 + $0x8] sm:$0xff] }
 0x359   :  { %1440 = vadd.xlane.f32.xlu1 %v1439_v49  ;;  %1561 = vmatpush.msra.mxu1 %v1534_v46  ;;  %v1734_v49 = vld [vmem:[%s2536_s6 + $0x3] ss:$0 sm:$0xff] }
 0x35a   :  { %v1433_v24 = vadd.f32 %v1432_v50, %v1431_v48  ;;  %v1532_v48 = vld [vmem:[%s2535_s5] sm:$0xff] }
 0x35b   :  { %1562 = vmatpush.msra.mxu1 %v1533_v47 }
 0x35c   :  { %v1436_v41 = vadd.f32 %v1731_v37, %v1433_v24 }
 0x35d   :  { %1563 = vmatpush.msra.mxu1 %v1532_v48 }
 0x35e   :  { %v1438_v53 = vadd.f32 %v1781_v51, %v1436_v41 }
 0x360   :  { %v1442_v54 = vsel %vm228_vm0, %v1438_v53, 0.0 }
 0x361   :  { %1443 = vadd.xlane.f32.xlu2 %v1442_v54 }
 0x3cc   :  { %v1441_v60 = vpop.xlane.xlu1 %1440 }
 0x3cd   :  { %v1452_v61 = vmul.f32 %v2453_v59, %v1441_v60 }
 0x3cf   :  { %v1454_v62 = vsub.f32 %v1437_v45, %v1452_v61 }
 0x3d1   :  { %v1456_v0 = vmul.f32 %v1454_v62, %v1454_v62 }
 0x3d3   :  { %v1458_v1 = vsel %vm228_vm0, %v1456_v0, 0.0 }
 0x3d4   :  { %1459 = vadd.xlane.f32.xlu0 %v1458_v1  ;;  %v1444_v63 = vpop.xlane.xlu2 %1443 }
 0x3d5   :  { %v1453_v2 = vmul.f32 %v2453_v59, %v1444_v63 }
 0x3d7   :  { %v1455_v3 = vsub.f32 %v1438_v53, %v1453_v2 }
 0x3d9   :  { %v1457_v4 = vmul.f32 %v1455_v3, %v1455_v3 }
 0x3db   :  { %v1461_v5 = vsel %vm228_vm0, %v1457_v4, 0.0 }
 0x3dc   :  { %1462 = vadd.xlane.f32.xlu1 %v1461_v5 }
 0x447   :  { %v1460_v31 = vpop.xlane.xlu0 %1459 }
 0x448   :  { %v1464_v9 = vmul.f32 %v1460_v31, %v2453_v59 }
 0x44a   :  { %v1466_v10 = vadd.f32 1e-05, %v1464_v9 }
 0x44c   :  { %1772 = vrsqrt.f32 %v1466_v10  ;;  %vm1474_vm7 = vweird.f32 %v1466_v10 }
 0x44f   :  { %v1463_v14 = vpop.xlane.xlu1 %1462 }
 0x450   :  { %v1465_v15 = vmul.f32 %v1463_v14, %v2453_v59 }
 0x452   :  { %v1773_v20 = vpop.eup %1772  ;;  %v1467_v21 = vadd.f32 1e-05, %v1465_v15 }
 0x453   :  { %v1469_v25 = vmul.f32 %v1773_v20, %v1466_v10  ;;  %vm1475_vm6 = vweird.f32 %v1773_v20 }
 0x454   :  { %1774 = vrsqrt.f32 %v1467_v21  ;;  %vm1476_vm8 = vmor %vm1474_vm7, %vm1475_vm6  ;;  %vm1484_vm10 = vweird.f32 %v1467_v21 }
 0x455   :  { %v1470_v26 = vmul.f32 %v1773_v20, %v1469_v25 }
 0x457   :  { %v1471_v27 = vmul.f32 0.5, %v1470_v26  ;;  %v1736_v26 = vld [vmem:[%s2536_s6 + $0x5] ss:$0 sm:$0xff] }
 0x459   :  { %v1472_v28 = vsub.f32 1.5, %v1471_v27 }
 0x45a   :  { %v1775_v29 = vpop.eup %1774 }
 0x45b   :  { %v1473_v32 = vmul.f32 %v1773_v20, %v1472_v28  ;;  %v1479_v33 = vmul.f32 %v1775_v29, %v1467_v21  ;;  %vm1485_vm9 = vweird.f32 %v1775_v29 }
 0x45c   :  { %vm1486_vm11 = vmor %vm1484_vm10, %vm1485_vm9 }
 0x45d   :  { %v1477_v36 = vsel %vm1476_vm8, %v1773_v20, %v1473_v32  ;;  %v1480_v11 = vmul.f32 %v1775_v29, %v1479_v33 }
 0x45e   :  { %v1488_v37 = vmul.f32 %v1477_v36, %v1454_v62 }
 0x45f   :  { %v1481_v39 = vmul.f32 0.5, %v1480_v11 }
 0x460   :  { %v1491_v8 = vmul.f32 %v1732_v35, %v1488_v37 }
 0x461   :  { %v1482_v40 = vsub.f32 1.5, %v1481_v39 }
 0x462   :  { %v1494_v42 = vadd.f32 %v1733_v38, %v1491_v8 }
 0x463   :  { %v1483_v16 = vmul.f32 %v1775_v29, %v1482_v40 }
 0x464   :  { %1699 = vmatmul.msk.f32.vlgmr.msra.gmra.mxu0 %vm228_vm0, %v1494_v42 }
 0x465   :  { %v1487_v17 = vsel %vm1486_vm11, %v1775_v29, %v1483_v16  ;;  %v1737_v29 = vld [vmem:[%s2536_s6 + $0x6] ss:$0 sm:$0xff]  ;;  %s1810_s6 = smov 128  }
 0x466   :  { %v1489_v43 = vmul.f32 %v1487_v17, %v1455_v3 }
 0x468   :  { %v1492_v44 = vmul.f32 %v1732_v35, %v1489_v43 }
 0x46a   :  { %v1495_v45 = vadd.f32 %v1733_v38, %v1492_v44 }
 0x46c   :  { %1700 = vmatmul.msk.f32.gmra.mxu0 %vm228_vm0, %v1495_v45 }
 0x4e1   :  { %v1524_v50 = vpop.f32.mrf.mxu0 }
 0x4e2   :  { %v1525_v24 = vadd.f32 %v1734_v49, %v1524_v50 }
 0x4e4   :  { %v1530_v41 = vmax.f32 %v1525_v24, 0.0 }
 0x4e6   :  { %1701 = vmatmul.msk.f32.vlgmr.msra.gmra.mxu1 %vm1541_vm12, %v1530_v41 }
 0x4e9   :  { %v1527_v51 = vpop.f32.mrf.mxu0 }
 0x4ea   :  { %v1528_v53 = vadd.f32 %v1734_v49, %v1527_v51 }
 0x4ec   :  { %v1531_v54 = vmax.f32 %v1528_v53, 0.0 }
 0x4ee   :  { %1702 = vmatmul.msk.f32.gmra.mxu1 %vm1541_vm12, %v1531_v54 }
 0x563   :  { %v1565_v52 = vpop.f32.mrf.mxu1 }
 0x564   :  { %v1566_v55 = vadd.f32 %v1735_v22, %v1565_v52 }
 0x566   :  { %v1571_v56 = vadd.f32 %v1566_v55, %v1494_v42 }
 0x568   :  { %v1573_v57 = vsel %vm228_vm0, %v1571_v56, 0.0 }
 0x569   :  { %1574 = vadd.xlane.f32.xlu2 %v1573_v57 }
 0x56b   :  { %v1568_v58 = vpop.f32.mrf.mxu1 }
 0x56c   :  { %v1569_v60 = vadd.f32 %v1735_v22, %v1568_v58 }
 0x56e   :  { %v1572_v61 = vadd.f32 %v1569_v60, %v1495_v45 }
 0x570   :  { %v1576_v62 = vsel %vm228_vm0, %v1572_v61, 0.0 }
 0x571   :  { %1577 = vadd.xlane.f32.xlu0 %v1576_v62 }
 0x5dc   :  { %v1575_v0 = vpop.xlane.xlu2 %1574 }
 0x5dd   :  { %v1579_v1 = vmul.f32 %v1575_v0, %v2453_v59 }
 0x5df   :  { %v1581_v63 = vsub.f32 %v1571_v56, %v1579_v1 }
 0x5e1   :  { %v1583_v2 = vmul.f32 %v1581_v63, %v1581_v63 }
 0x5e3   :  { %v1585_v3 = vsel %vm228_vm0, %v1583_v2, 0.0 }
 0x5e4   :  { %v1578_v4 = vpop.xlane.xlu0 %1577  ;;  %1586 = vadd.xlane.f32.xlu1 %v1585_v3 }
 0x5e5   :  { %v1580_v5 = vmul.f32 %v1578_v4, %v2453_v59 }
 0x5e7   :  { %v1582_v30 = vsub.f32 %v1572_v61, %v1580_v5 }
 0x5e9   :  { %v1584_v6 = vmul.f32 %v1582_v30, %v1582_v30 }
 0x5eb   :  { %v1588_v19 = vsel %vm228_vm0, %v1584_v6, 0.0 }
 0x5ec   :  { %1589 = vadd.xlane.f32.xlu2 %v1588_v19 }
 0x657   :  { %v1587_v7 = vpop.xlane.xlu1 %1586 }
 0x658   :  { %v1591_v31 = vmul.f32 %v1587_v7, %v2453_v59 }
 0x65a   :  { %v1593_v9 = vadd.f32 1e-05, %v1591_v31 }
 0x65c   :  { %1776 = vrsqrt.f32 %v1593_v9  ;;  %vm1601_vm14 = vweird.f32 %v1593_v9 }
 0x65f   :  { %v1590_v10 = vpop.xlane.xlu2 %1589 }
 0x660   :  { %v1592_v34 = vmul.f32 %v1590_v10, %v2453_v59 }
 0x662   :  { %v1777_v12 = vpop.eup %1776  ;;  %v1594_v13 = vadd.f32 1e-05, %v1592_v34 }
 0x663   :  { %v1596_v14 = vmul.f32 %v1777_v12, %v1593_v9  ;;  %vm1602_vm13 = vweird.f32 %v1777_v12 }
 0x664   :  { %1778 = vrsqrt.f32 %v1594_v13  ;;  %vm1603_vm15 = vmor %vm1601_vm14, %vm1602_vm13  ;;  %vm1611_vm3 = vweird.f32 %v1594_v13 }
 0x665   :  { %v1597_v15 = vmul.f32 %v1777_v12, %v1596_v14 }
 0x667   :  { %v1598_v18 = vmul.f32 0.5, %v1597_v15 }
 0x669   :  { %v1599_v20 = vsub.f32 1.5, %v1598_v18 }
 0x66a   :  { %v1779_v21 = vpop.eup %1778 }
 0x66b   :  { %v1600_v23 = vmul.f32 %v1777_v12, %v1599_v20  ;;  %v1606_v25 = vmul.f32 %v1779_v21, %v1594_v13  ;;  %vm1612_vm2 = vweird.f32 %v1779_v21 }
 0x66c   :  { %vm1613_vm4 = vmor %vm1611_vm3, %vm1612_vm2 }
 0x66d   :  { %v1604_v27 = vsel %vm1603_vm15, %v1777_v12, %v1600_v23  ;;  %v1607_v28 = vmul.f32 %v1779_v21, %v1606_v25 }
 0x66e   :  { %v1615_v59 = vmul.f32 %v1604_v27, %v1581_v63 }
 0x66f   :  { %v1608_v32 = vmul.f32 0.5, %v1607_v28 }
 0x670   :  { %v1618_v33 = vmul.f32 %v1736_v26, %v1615_v59 }
 0x671   :  { %v1609_v35 = vsub.f32 1.5, %v1608_v32 }
 0x672   :  { %v1621_v36 = vadd.f32 %v1737_v29, %v1618_v33 }
 0x673   :  { %v1610_v11 = vmul.f32 %v1779_v21, %v1609_v35 }
 0x674   :  { %1623 = vst.msk [vmem:[#allocation2] sm:$0xff] %vm228_vm0, %v1621_v36 }
 0x675   :  { %v1614_v37 = vsel %vm1613_vm4, %v1779_v21, %v1610_v11 }
 0x676   :  { %v1616_v38 = vmul.f32 %v1614_v37, %v1582_v30 }
 0x678   :  { %v1619_v39 = vmul.f32 %v1736_v26, %v1616_v38 }
 0x67a   :  { %v1622_v8 = vadd.f32 %v1737_v29, %v1619_v39 }
 0x67c   :  { %1624 = vst.msk [vmem:[#allocation2 + $0x8] sm:$0xff] %vm228_vm0, %v1622_v8 }
 0x67d   :  { %1637 = dma.vmem_to_hbm [thread:$0]  %s1630_s8, 256, %s1632_s11, [#allocation3], %s1810_s6, %s1810_s6, %s1811_s12  }
 0x67e   :  { %1806 = dma.done.wait [#allocation3], 256  }
 0x67f   :  { %1807 = vsyncadd [#allocation3], 4294967040 }
 0x680   :  { %1642 = vsyncpa [#allocation3], 1 }

</bundles_post_ra>
